<compile_context>
chip_gen: v7x
topology: tpu7x:2x2x1
jax: 0.10.0
libtpu: 0.0.40
codegen_flags: <defaults>
</compile_context>

<pallas_src>
from functools import partial

import jax
import jax.numpy as jnp
from jax.experimental import pallas as pl
from jax.experimental.pallas import tpu as pltpu

_I32_MIN = -2147483648
_I32_MAX = 2147483647


def _order_keys(x):
    """Monotone int32 key: key(a) < key(b)  <=>  a < b (as f32); +NaN sorts largest."""
    b = pltpu.bitcast(x.astype(jnp.float32), jnp.int32)
    return b ^ ((b >> 31) & jnp.int32(0x7FFFFFFF))


def _topk_pick_kernel(x_ref, o_ref, *, k: int):
    """Small-k path: k sequential argmax picks, mask accumulation, single store."""
    x = x_ref[...]
    R, D = x.shape
    key = _order_keys(x)
    col = jax.lax.broadcasted_iota(jnp.int32, (1, D), 1)   # (1, D): broadcasts, never (R, D)
    sentinel = jnp.int32(_I32_MIN)

    def body(_, keep):
        avail = jnp.where(keep, sentinel, key)
        m = jnp.max(avail, axis=-1, keepdims=True)
        # Lowest-index occurrence of the max.  Already-kept entries hold the
        # sentinel so they cannot match m (only the degenerate 0xFFFFFFFF NaN
        # bit pattern maps onto the sentinel; ignored — matches review note).
        first = jnp.min(jnp.where(avail == m, col, jnp.int32(D)),
                        axis=-1, keepdims=True)
        return keep | (col == first)

    keep = jax.lax.fori_loop(0, k, body, jnp.zeros((R, D), dtype=jnp.bool_),
                             unroll=(k <= 8))
    o_ref[...] = jnp.where(keep, x, jnp.zeros_like(x))


def _topk_threshold_kernel(x_ref, o_ref, *, k: int, col_iters: int):
    """k-independent path: binary-search the k-th largest key, then mask once."""
    x = x_ref[...]
    R, D = x.shape
    key = _order_keys(x)
    kk = jnp.int32(k)

    # Stage 1: per-row threshold = k-th largest key (32-step binary search).
    lo0 = jnp.full((R, 1), jnp.int32(_I32_MIN))
    hi0 = jnp.full((R, 1), jnp.int32(_I32_MAX))

    def key_body(_, carry):
        lo, hi = carry
        mid = (lo >> 1) + (hi >> 1) + ((lo | hi) & 1)   # overflow-free ceil midpoint
        cnt = jnp.sum((key >= mid).astype(jnp.int32), axis=-1, keepdims=True)
        p = cnt >= kk
        return jnp.where(p, mid, lo), jnp.where(p, hi, mid - 1)

    thr, _ = jax.lax.fori_loop(0, 32, key_body, (lo0, hi0))

    # Common case (continuous data): exactly k entries satisfy key >= thr in
    # every row -> one compare, one reduce, one masked store.  No column iota.
    ge = key >= thr
    cnt_ge = jnp.sum(ge.astype(jnp.int32), axis=-1, keepdims=True)
    o_ref[...] = jnp.where(ge, x, jnp.zeros_like(x))

    # Rare case: some row has more ties at thr than free slots.  Binary-search
    # the per-row column cutoff (lowest indices win) and overwrite the store.
    # Gate uses an f32 max-reduce (counts <= D < 2^24, exact in f32).
    overfull = jnp.max((cnt_ge - kk).astype(jnp.float32)) > 0.0

    @pl.when(overfull)
    def _():
        greater = key > thr
        tie = ge & jnp.logical_not(greater)
        n_greater = jnp.sum(greater.astype(jnp.int32), axis=-1, keepdims=True)
        need = kk - n_greater                       # >= 1 by construction of thr
        col = jax.lax.broadcasted_iota(jnp.int32, (1, D), 1)
        clo0 = jnp.zeros((R, 1), jnp.int32)
        chi0 = jnp.full((R, 1), jnp.int32(D - 1))

        def col_body(_, carry):
            clo, chi = carry
            mid = (clo + chi) >> 1
            cnt = jnp.sum((tie & (col <= mid)).astype(jnp.int32),
                          axis=-1, keepdims=True)
            q = cnt >= need
            return jnp.where(q, clo, mid + 1), jnp.where(q, mid, chi)

        _, ccut = jax.lax.fori_loop(0, col_iters, col_body, (clo0, chi0))
        keep = greater | (tie & (col <= ccut))
        o_ref[...] = jnp.where(keep, x, jnp.zeros_like(x))


def _vmem_capacity_bytes() -> int:
    try:
        return int(pltpu.get_tpu_info().vmem_capacity_bytes)
    except Exception:
        return 64 << 20          # unknown target: assume the small (v7x) VMEM


def _tiling_params():
    """(row-tile working-set budget, max tile rows, scoped-VMEM limit) per generation."""
    if _vmem_capacity_bytes() >= (100 << 20):       # v5e / v6e: 128 MiB physical VMEM
        return 48 << 20, 2048, 96 << 20
    return 20 << 20, 512, 48 << 20                  # v7x-class: 64 MiB per-core VMEM


def _choose_row_tile(n_rows: int, d: int, budget: int, max_tile: int) -> int:
    # ~10 live full-width (row_tile, D) 32-bit copies: 2x double-buffered input,
    # 2x double-buffered output, plus ~6 in-kernel temporaries (x, key, masks, ...).
    copies = 10
    cap = (budget // (copies * 4 * max(d, 1))) // 8 * 8
    cap = max(8, min(max_tile, cap))
    n8 = ((max(n_rows, 1) + 7) // 8) * 8
    tile = min(cap, n8)
    # Keep >= ~4 grid steps when the row count allows it, so
    # dimension_semantics=("parallel",) has work for both v7x TensorCores.
    min_steps = 4
    target = ((max(n_rows, 1) + min_steps - 1) // min_steps + 7) // 8 * 8
    return int(max(8, min(tile, max(target, 8))))


def _pick_cutoff(d: int) -> int:
    # Threshold path ~ (32 + log2 D) full-width passes regardless of k; one pick
    # iteration ~2 cross-lane reduces -> crossover well above the old k=8.
    return min(24, max(8, (32 + max(d - 1, 1).bit_length()) // 2))


def topk_neurons(x: jax.Array, k: int) -> jax.Array:
    """TopKNeurons(k): keep the k largest entries along the last axis, zero the rest."""
    orig_shape = x.shape
    D = int(orig_shape[-1])
    if not (1 <= k <= D):
        raise ValueError("k must satisfy 1 <= k <= feature dim")

    x2 = x.reshape(-1, D)
    N = x2.shape[0]
    budget, max_tile, vmem_limit = _tiling_params()
    row_tile = _choose_row_tile(N, D, budget, max_tile)
    grid = (pl.cdiv(N, row_tile),)   # ragged last block: no wrapper pad/slice passes

    if k <= _pick_cutoff(D):
        kernel = partial(_topk_pick_kernel, k=k)
    else:
        kernel = partial(_topk_threshold_kernel, k=k,
                         col_iters=max(1, (D - 1).bit_length()))

    out = pl.pallas_call(
        kernel,
        out_shape=jax.ShapeDtypeStruct((N, D), x.dtype),
        grid=grid,
        in_specs=[pl.BlockSpec((row_tile, D), lambda i: (i, 0))],
        out_specs=pl.BlockSpec((row_tile, D), lambda i: (i, 0)),
        compiler_params=pltpu.CompilerParams(
            dimension_semantics=("parallel",),   # shards grid across v7x's 2 TCs
            vmem_limit_bytes=vmem_limit,
        ),
    )(x2)
    return out.reshape(orig_shape)


def _reference_topk(x: jax.Array, k: int) -> jax.Array:
    """Pure-JAX reference matching torch.topk + scatter (Identity postact)."""
    D = x.shape[-1]
    vals, idx = jax.lax.top_k(x, k)
    zeros = jnp.zeros((x.size // D, D), x.dtype)
    out = jax.vmap(lambda z, i, v: z.at[i].set(v))(
        zeros, idx.reshape(-1, k), vals.reshape(-1, k))
    return out.reshape(x.shape)


if __name__ == "__main__":
    key = jax.random.PRNGKey(0)
    k1, k2, k3, k4 = jax.random.split(key, 4)

    # Path 1: small k -> unrolled argmax-pick loop.  batch=2, seq=8, hidden=32, k=4.
    x_a = jax.random.normal(k1, (2, 8, 32), dtype=jnp.float32)
    y_a = jax.block_until_ready(topk_neurons(x_a, 4))
    ref_a = _reference_topk(x_a, 4)
    assert y_a.shape == x_a.shape and y_a.dtype == x_a.dtype
    assert jnp.array_equal(y_a, ref_a), "pick-loop path mismatch vs reference"

    # Path 2: larger k -> k-independent threshold search (lane-dense D=128), k=24.
    x_b = jax.random.normal(k2, (2, 8, 128), dtype=jnp.float32)
    y_b = jax.block_until_ready(topk_neurons(x_b, 24))
    ref_b = _reference_topk(x_b, 24)
    assert y_b.shape == x_b.shape and y_b.dtype == x_b.dtype
    assert jnp.array_equal(y_b, ref_b), "threshold path mismatch vs reference"

    # Path 3: heavy ties -> exercises the threshold path's rare refine branch.
    # (tie positions are implementation-defined, so check count / value multiset.)
    x_c = jax.random.randint(k3, (2, 8, 128), 1, 6).astype(jnp.float32)
    y_c = jax.block_until_ready(topk_neurons(x_c, 24))
    vals_c = jax.lax.top_k(x_c, 24)[0]
    nz_c = jnp.sum(y_c != 0, axis=-1)
    assert jnp.array_equal(nz_c, jnp.full(nz_c.shape, 24)), "tie path kept wrong count"
    assert jnp.array_equal(jnp.sum(y_c, axis=-1), jnp.sum(vals_c, axis=-1)), \
        "tie path kept wrong values"

    # Path 4: ties through the pick path (checks the trimmed tie-break).
    x_d = jax.random.randint(k4, (2, 8, 32), 1, 4).astype(jnp.float32)
    y_d = jax.block_until_ready(topk_neurons(x_d, 3))
    vals_d = jax.lax.top_k(x_d, 3)[0]
    nz_d = jnp.sum(y_d != 0, axis=-1)
    assert jnp.array_equal(nz_d, jnp.full(nz_d.shape, 3)), "pick tie path kept wrong count"
    assert jnp.array_equal(jnp.sum(y_d, axis=-1), jnp.sum(vals_d, axis=-1)), \
        "pick tie path kept wrong values"

    print("KERNEL_OK")
</pallas_src>

<mosaic_0001>
module attributes {stable_mosaic.version = 11 : i64} {
  func.func @_topk_pick_kernel(%arg0: i32, %arg1: memref<8x32xf32, #tpu.memory_space<vmem>>, %arg2: memref<8x32xf32, #tpu.memory_space<vmem>>) attributes {dimension_semantics = [#tpu.dimension_semantics<parallel>], iteration_bounds = array<i64: 2>, scalar_prefetch = 0 : i64, scratch_operands = 0 : i64, tpu.core_type = #tpu.core_type<tc>, window_params = [{transform_indices = @transform_0, window_bounds = array<i64: 8, 32>}, {transform_indices = @transform_1, window_bounds = array<i64: 8, 32>}]} {
    %c0 = arith.constant 0 : index
    %c0_0 = arith.constant 0 : index
    %0 = vector.load %arg1[%c0, %c0_0] : memref<8x32xf32, #tpu.memory_space<vmem>>, vector<8x32xf32>
    %1 = tpu.bitcast %0 : vector<8x32xf32> -> vector<8x32xi32>
    %c31_i32 = arith.constant 31 : i32
    %2 = vector.broadcast %c31_i32 : i32 to vector<8x32xi32>
    %3 = arith.shrsi %1, %2 : vector<8x32xi32>
    %c2147483647_i32 = arith.constant 2147483647 : i32
    %4 = vector.broadcast %c2147483647_i32 : i32 to vector<8x32xi32>
    %5 = arith.andi %3, %4 : vector<8x32xi32>
    %6 = arith.xori %1, %5 : vector<8x32xi32>
    %7 = tpu.iota {dimensions = array<i32: 1>} : vector<1x32xi32>
    %false = arith.constant false
    %8 = vector.broadcast %false : i1 to vector<8x32xi1>
    %c-2147483648_i32 = arith.constant -2147483648 : i32
    %c0_i32 = arith.constant 0 : i32
    %9 = vector.broadcast %c-2147483648_i32 : i32 to vector<8x32xi32>
    %10 = arith.select %8, %9, %6 : vector<8x32xi1>, vector<8x32xi32>
    %cst = arith.constant dense<-2147483648> : vector<8xi32>
    %11 = vector.multi_reduction <maxsi>, %10, %cst [1] : vector<8x32xi32> to vector<8xi32>
    %12 = vector.shape_cast %11 : vector<8xi32> to vector<8x1xi32>
    %13 = vector.broadcast %12 : vector<8x1xi32> to vector<8x32xi32>
    %14 = arith.cmpi eq, %10, %13 : vector<8x32xi32>
    %c32_i32 = arith.constant 32 : i32
    %15 = vector.shape_cast %7 : vector<1x32xi32> to vector<1x32xi32>
    %16 = vector.broadcast %15 : vector<1x32xi32> to vector<8x32xi32>
    %17 = vector.broadcast %c32_i32 : i32 to vector<8x32xi32>
    %18 = arith.select %14, %16, %17 : vector<8x32xi1>, vector<8x32xi32>
    %cst_1 = arith.constant dense<2147483647> : vector<8xi32>
    %19 = vector.multi_reduction <minsi>, %18, %cst_1 [1] : vector<8x32xi32> to vector<8xi32>
    %20 = vector.shape_cast %19 : vector<8xi32> to vector<8x1xi32>
    %21 = vector.broadcast %7 : vector<1x32xi32> to vector<8x32xi32>
    %22 = vector.broadcast %20 : vector<8x1xi32> to vector<8x32xi32>
    %23 = arith.cmpi eq, %21, %22 : vector<8x32xi32>
    %24 = arith.ori %8, %23 : vector<8x32xi1>
    %c1_i32 = arith.constant 1 : i32
    %25 = vector.broadcast %c-2147483648_i32 : i32 to vector<8x32xi32>
    %26 = arith.select %24, %25, %6 : vector<8x32xi1>, vector<8x32xi32>
    %cst_2 = arith.constant dense<-2147483648> : vector<8xi32>
    %27 = vector.multi_reduction <maxsi>, %26, %cst_2 [1] : vector<8x32xi32> to vector<8xi32>
    %28 = vector.shape_cast %27 : vector<8xi32> to vector<8x1xi32>
    %29 = vector.broadcast %28 : vector<8x1xi32> to vector<8x32xi32>
    %30 = arith.cmpi eq, %26, %29 : vector<8x32xi32>
    %c32_i32_3 = arith.constant 32 : i32
    %31 = vector.shape_cast %7 : vector<1x32xi32> to vector<1x32xi32>
    %32 = vector.broadcast %31 : vector<1x32xi32> to vector<8x32xi32>
    %33 = vector.broadcast %c32_i32_3 : i32 to vector<8x32xi32>
    %34 = arith.select %30, %32, %33 : vector<8x32xi1>, vector<8x32xi32>
    %cst_4 = arith.constant dense<2147483647> : vector<8xi32>
    %35 = vector.multi_reduction <minsi>, %34, %cst_4 [1] : vector<8x32xi32> to vector<8xi32>
    %36 = vector.shape_cast %35 : vector<8xi32> to vector<8x1xi32>
    %37 = vector.broadcast %7 : vector<1x32xi32> to vector<8x32xi32>
    %38 = vector.broadcast %36 : vector<8x1xi32> to vector<8x32xi32>
    %39 = arith.cmpi eq, %37, %38 : vector<8x32xi32>
    %40 = arith.ori %24, %39 : vector<8x32xi1>
    %c2_i32 = arith.constant 2 : i32
    %41 = vector.broadcast %c-2147483648_i32 : i32 to vector<8x32xi32>
    %42 = arith.select %40, %41, %6 : vector<8x32xi1>, vector<8x32xi32>
    %cst_5 = arith.constant dense<-2147483648> : vector<8xi32>
    %43 = vector.multi_reduction <maxsi>, %42, %cst_5 [1] : vector<8x32xi32> to vector<8xi32>
    %44 = vector.shape_cast %43 : vector<8xi32> to vector<8x1xi32>
    %45 = vector.broadcast %44 : vector<8x1xi32> to vector<8x32xi32>
    %46 = arith.cmpi eq, %42, %45 : vector<8x32xi32>
    %c32_i32_6 = arith.constant 32 : i32
    %47 = vector.shape_cast %7 : vector<1x32xi32> to vector<1x32xi32>
    %48 = vector.broadcast %47 : vector<1x32xi32> to vector<8x32xi32>
    %49 = vector.broadcast %c32_i32_6 : i32 to vector<8x32xi32>
    %50 = arith.select %46, %48, %49 : vector<8x32xi1>, vector<8x32xi32>
    %cst_7 = arith.constant dense<2147483647> : vector<8xi32>
    %51 = vector.multi_reduction <minsi>, %50, %cst_7 [1] : vector<8x32xi32> to vector<8xi32>
    %52 = vector.shape_cast %51 : vector<8xi32> to vector<8x1xi32>
    %53 = vector.broadcast %7 : vector<1x32xi32> to vector<8x32xi32>
    %54 = vector.broadcast %52 : vector<8x1xi32> to vector<8x32xi32>
    %55 = arith.cmpi eq, %53, %54 : vector<8x32xi32>
    %56 = arith.ori %40, %55 : vector<8x32xi1>
    %c3_i32 = arith.constant 3 : i32
    %57 = vector.broadcast %c-2147483648_i32 : i32 to vector<8x32xi32>
    %58 = arith.select %56, %57, %6 : vector<8x32xi1>, vector<8x32xi32>
    %cst_8 = arith.constant dense<-2147483648> : vector<8xi32>
    %59 = vector.multi_reduction <maxsi>, %58, %cst_8 [1] : vector<8x32xi32> to vector<8xi32>
    %60 = vector.shape_cast %59 : vector<8xi32> to vector<8x1xi32>
    %61 = vector.broadcast %60 : vector<8x1xi32> to vector<8x32xi32>
    %62 = arith.cmpi eq, %58, %61 : vector<8x32xi32>
    %c32_i32_9 = arith.constant 32 : i32
    %63 = vector.shape_cast %7 : vector<1x32xi32> to vector<1x32xi32>
    %64 = vector.broadcast %63 : vector<1x32xi32> to vector<8x32xi32>
    %65 = vector.broadcast %c32_i32_9 : i32 to vector<8x32xi32>
    %66 = arith.select %62, %64, %65 : vector<8x32xi1>, vector<8x32xi32>
    %cst_10 = arith.constant dense<2147483647> : vector<8xi32>
    %67 = vector.multi_reduction <minsi>, %66, %cst_10 [1] : vector<8x32xi32> to vector<8xi32>
    %68 = vector.shape_cast %67 : vector<8xi32> to vector<8x1xi32>
    %69 = vector.broadcast %7 : vector<1x32xi32> to vector<8x32xi32>
    %70 = vector.broadcast %68 : vector<8x1xi32> to vector<8x32xi32>
    %71 = arith.cmpi eq, %69, %70 : vector<8x32xi32>
    %72 = arith.ori %56, %71 : vector<8x32xi1>
    %cst_11 = arith.constant 0.000000e+00 : f32
    %73 = vector.broadcast %cst_11 : f32 to vector<8x32xf32>
    %74 = arith.select %72, %0, %73 : vector<8x32xi1>, vector<8x32xf32>
    %c0_12 = arith.constant 0 : index
    %c0_13 = arith.constant 0 : index
    %75 = vector.load %arg2[%c0_12, %c0_13] : memref<8x32xf32, #tpu.memory_space<vmem>>, vector<8x32xf32>
    tpu.vector_store %arg2[%c0_12, %c0_13], %74 {strides = array<i32>} : memref<8x32xf32, #tpu.memory_space<vmem>>, vector<8x32xf32>,
    return
  }
  func.func @transform_0(%arg0: i32) -> (i32, i32) {
    %c0_i32 = arith.constant 0 : i32
    %c0_i32_0 = arith.constant 0 : i32
    return %arg0, %c0_i32 : i32, i32
  }
  func.func @transform_1(%arg0: i32) -> (i32, i32) {
    %c0_i32 = arith.constant 0 : i32
    %c0_i32_0 = arith.constant 0 : i32
    return %arg0, %c0_i32 : i32, i32
  }
}

</mosaic_0001>

<bundles_post_ra>
// kernel: tpu_custom_call.1
= control target key start
LH: loop header
LB: loop body
LE: loop exit
PB: predicated region body
PF: predicated region fallthrough
CT: control target
= control target key end

     0   :  { %6 = vsyncpa [#allocation3], 0  ;;  %s748_s0 = inlined_call_operand.hbm [shape: f32[16,32], index: 0, kind: input, shape index: {}]   ;;  %s749_s1 = inlined_call_operand.hbm [shape: f32[16,32], index: 1, kind: output, shape index: {}]  }
   0x1   :  { %8 = vsyncpa [#allocation3 + $0x1], 0 }
   0x2   :  { %9 = vsyncpa [#allocation4], 0 }
   0x3   :  { %11 = vsyncpa [#allocation4 + $0x1], 0  ;;  %s532_s6 = smov 0   ;;  %s534_s7 = smov 0  }
   0x4   :  { %s536_s8 = smov 0   ;;  %s538_s9 = smov 0  }
   0x5 LB: > { %s553_s10 = sadd.s32 4294967295, %s518_s9   ;;  %s364_s11 = sadd.s32 4294967294, %s518_s9   ;;  %s518_s9 = sphi %s538_s9, %s768_s9   ;;  %s514_s8 = sphi %s536_s8, %s767_s8   ;;  %s510_s7 = sphi %s534_s7, %s766_s7   ;;  %s506_s6 = sphi %s532_s6, %s765_s6  }
   0x6   : > { %s557_s12 = sadd.s32 1, %s518_s9   ;;  %s24_s13 = sadd.s32 1, %s514_s8 }
   0x7   : > { %s21_s14 = ssub.s32 %s518_s9, %s557_s12  ;;  %p31_p0 = scmp.ne.s32.totalorder %s514_s8, %s510_s7 }
   0x8   : > { %p22_p1 = scmp.eq.s32.totalorder %s21_s14, 0  ;;  %p32_p2 = scmp.eq.s32.totalorder %s518_s9, 0 }
   0x9   : > { %p37_p3 = scmp.ne.s32.totalorder %s510_s7, %s506_s6  ;;  %p38_p4 = scmp.eq.s32.totalorder %s553_s10, 0 }
   0xa   : > { %s569_s15 = scalar_select %p22_p1, %s514_s8, %s24_s13  }
   0xb   : > { %p571_p5 = por %p32_p2, %p31_p0  ;;  %p575_p6 = por %p38_p4, %p37_p3 }
   0xc   : > { %p61_p7 = scmp.eq.s32.totalorder %s553_s10, 1  ;;  %p67_p8 = scmp.eq.s32.totalorder %s364_s11, 1 }
   0xd   : > { %p388_p10 = scmp.lt.s32.totalorder %s518_s9, 2  ;;  %s87_s20 = sand.u32 1, %s514_s8  }
   0xe   : > { %p582_p11 = por %p61_p7, %p31_p0  ;;  %p586_p12 = por %p67_p8, %p37_p3 }
   0xf   : > { %s368_s21 = sshll.u32 %s518_s9, 7  ;;  %s367_s22 = sshll.u32 %s87_s20, 3 }
  0x10   : > { %s753_s18 = scalar_select %p582_p11, 1, 0 }
  0x11   : > { %s754_s19 = scalar_select %p586_p12, 1, 0 }
  0x12   : > { %s595_s25 = scalar_lea.hbm %s748_s0, %s368_s21  ;;  %s91_s26 = scalar_lea.vmem [#allocation2], %s367_s22 }
  0x13   : > { %s98_s27 = sshll.u32 %s91_s26, 4  ;;  %p599_p13 = pnand %p388_p10, %p571_p5  ;;  %s603_s27 = int_to_ptr.vmem [resolvable:$true] %s98_s27 }
  0x14   : > { %s88_s29 = scalar_lea.sflag [#allocation3], %s87_s20  ;;  %s422_s30 = scalar_lea.hbm %s595_s25, 128 }
  0x15   : > { %p423_p2 = scmp.ne.s32.totalorder %s595_s25, %s422_s30  ;;  %p424_p3 = pneg %p599_p13 }
  0x16   : > { %s427_s4 = scalar_lea.hbm %s748_s0, 256  ;;  %p428_p5 = scmp.lt.u32.totalorder %s595_s25, %s748_s0 }
  0x17   : > { %p425_p4 = pnand %p424_p3, %p423_p2  ;;  %p429_p8 = scmp.lt.u32.totalorder %s427_s4, %s422_s30 }
  0x18   : > { %p431_p9 = scmp.lt.u32.totalorder %s422_s30, %s595_s25 }
  0x19   : > { %p426_p7 = pneg %p425_p4  ;;  %p430_p10 = por %p429_p8, %p428_p5 }
  0x1b   : > { %p432_p0 = por %p431_p9, %p430_p10 }
  0x1d   : > { %p433_p1 = pnand %p432_p0, %p426_p7 }
  0x1f   : > { %436 = shalt.err (!%p433_p1)
}
  0x20   : > { %s437_s13 = scalar_lea.vmem %s603_s27, 128  ;;  %s520_s14 = smov [#allocation2]  }
  0x21   : > { %p438_p2 = scmp.ne.s32.totalorder %s603_s27, %s437_s13  ;;  %s442_s16 = sshll.u32 %s520_s14, 4  ;;  %s443_s16 = int_to_ptr.vmem [resolvable:$false] %s442_s16 }
  0x22   : > { %s444_s20 = scalar_lea.vmem %s443_s16, 256  ;;  %p445_p11 = scmp.lt.s32.totalorder %s603_s27, %s443_s16 }
  0x23   : > { %p440_p4 = pnand %p438_p2, %p424_p3  ;;  %p446_p5 = scmp.lt.s32.totalorder %s444_s20, %s437_s13 }
  0x25   : > { %p441_p12 = pneg %p440_p4  ;;  %p447_p8 = por %p446_p5, %p445_p11 }
  0x27   : > { %p448_p9 = pnand %p447_p8, %p441_p12 }
  0x29   : > { %451 = shalt.err (!%p448_p9)
}
  0x2a   : > { %383 = dma.hbm_to_vmem [thread:$0]  (!%p599_p13), %s595_s25, 128, %s603_s27, %s88_s29  }
  0x2b   : > { %p756_p0 = scmp.lt.s32.totalorder %s518_s9, 3  ;;  %p757_p1 = scmp.ge.s32.totalorder %s518_s9, 1 }
  0x2d   : > { %p104_p3 = pnand %p757_p1, %p756_p0 }
  0x2e   : > { %s637_s21 = sand.u32 (!%p104_p3), 1, %s510_s7  }
  0x2f   : > { %107 = sbr.rel (%p104_p3) target bundleno = 2455 (0x997), region = 24  ;;  %s370_s22 = sshll.u32 (!%p104_p3), %s637_s21, 3 }
  0x30   : > { %s110_s23 = scalar_lea.sflag (!%p104_p3), [#allocation3], %s637_s21  ;;  %s113_s24 = scalar_lea.vmem (!%p104_p3), [#allocation2], %s370_s22 }
  0x36   : > { %497 = dma.done.wait (%p575_p6), %s110_s23, 128  }
  0x37   : > { %499 = vsyncadd (%p575_p6), %s110_s23, 4294967168  ;;  %v647_v0 = vld [vmem:[%s113_s24] sm:$0xff]  ;;  %vm139_vm0 = vcmask 261120   ;;  %v137_v12 = vlaneseq  ;;  %s373_s17 = sshll.u32 %s553_s10, 7  ;;  %s131_s25 = scalar_lea.vmem [#allocation5], %s370_s22 }
  0x38   : > { %v134_v1 = vshra.s32 %v647_v0, 31  ;;  %s294_s26 = sshll.u32 %s131_s25, 4  ;;  %s702_s29 = scalar_lea.hbm %s749_s1, %s373_s17  ;;  %s704_s26 = int_to_ptr.vmem [resolvable:$true] %s294_s26 }
  0x39   : > { %v655_v16 = vand.u32 127, %v137_v12  ;;  %s281_s10 = scalar_lea.sflag [#allocation4], %s637_s21  ;;  %s452_s30 = scalar_lea.vmem %s704_s26, 128 }
  0x3a   : > { %v135_v2 = vand.u32 2147483647, %v134_v1  ;;  %p453_p6 = scmp.ne.s32.totalorder %s704_s26, %s452_s30  ;;  %p762_p11 = scmp.ne.s32.totalorder %s753_s18, 0 }
  0x3b   : > { %s521_s2 = smov [#allocation5]  }
  0x3c   : > { %v651_v3 = vxor.u32 %v135_v2, %v647_v0  ;;  %p454_p12 = pnand %p453_p6, %p762_p11  ;;  %s456_s3 = sshll.u32 %s521_s2, 4  ;;  %s457_s3 = int_to_ptr.vmem [resolvable:$false] %s456_s3 }
  0x3d   : > { %s458_s4 = scalar_lea.vmem %s457_s3, 256  ;;  %p459_p7 = scmp.lt.s32.totalorder %s704_s26, %s457_s3 }
  0x3e   : > { %v140_v4 = vsel %vm139_vm0, %v651_v3, 2147483648  ;;  %p455_p13 = pneg %p454_p12  ;;  %p460_p10 = scmp.lt.s32.totalorder %s458_s4, %s452_s30 }
  0x3f   : > { %v142_v5 = vshra.s32 %v140_v4, 16  ;;  %v141_v7 = vand.u32 65535, %v140_v4 }
  0x40   : > { %p461_p2 = por %p460_p10, %p459_p7 }
  0x41   : > { %v144_v6 = vcvt.s32.f32 %v142_v5  ;;  %v143_v8 = vcvt.s32.f32 %v141_v7 }
  0x42   : > { %p462_p4 = pnand %p461_p2, %p455_p13 }
  0x43   : > { %145 = vmax.xlane.f32.xlu0 %v144_v6 }
  0xd0   : > { %v146_v9 = vpop.xlane.xlu0 %145 }
  0xd1   : > { %vm147_vm1 = vcmp.eq.f32.partialorder %v144_v6, %v146_v9  ;;  %v152_v11 = vcvt.f32.s32 %v146_v9 }
  0xd2   : > { %v148_v10 = vsel %vm147_vm1, %v143_v8, -inf }
  0xd3   : > { %149 = vmax.xlane.f32.xlu0 %v148_v10  ;;  %v153_v14 = vshll.u32 %v152_v11, 16 }
 0x160   : > { %v150_v13 = vpop.xlane.xlu0 %149 }
 0x161   : > { %v151_v15 = vcvt.f32.s32 %v150_v13 }
 0x163   : > { %v154_v17 = vadd.s32 %v153_v14, %v151_v15 }
 0x165   : > { %vm155_vm2 = vcmp.eq.s32.totalorder %v651_v3, %v154_v17 }
 0x166   : > { %v156_v18 = vsel %vm155_vm2, %v655_v16, 32 }
 0x167   : > { %v157_v19 = vsel %vm139_vm0, %v156_v18, 2147483647 }
 0x168   : > { %v159_v20 = vshra.s32 %v157_v19, 16  ;;  %v158_v22 = vand.u32 65535, %v157_v19 }
 0x16a   : > { %v161_v21 = vcvt.s32.f32 %v159_v20  ;;  %v160_v24 = vcvt.s32.f32 %v158_v22 }
 0x16c   : > { %162 = vmin.xlane.f32.xlu1 %v161_v21 }
 0x1f9   : > { %v163_v23 = vpop.xlane.xlu1 %162 }
 0x1fa   : > { %vm164_vm3 = vcmp.eq.f32.partialorder %v161_v21, %v163_v23  ;;  %v169_v26 = vcvt.f32.s32 %v163_v23 }
 0x1fb   : > { %v165_v25 = vsel %vm164_vm3, %v160_v24, inf }
 0x1fc   : > { %166 = vmin.xlane.f32.xlu1 %v165_v25  ;;  %v170_v28 = vshll.u32 %v169_v26, 16 }
 0x289   : > { %v167_v27 = vpop.xlane.xlu1 %166 }
 0x28a   : > { %v168_v29 = vcvt.f32.s32 %v167_v27 }
 0x28c   : > { %v171_v30 = vadd.s32 %v170_v28, %v168_v29 }
 0x28e   : > { %vm172_vm4 = vcmp.eq.s32.totalorder %v655_v16, %v171_v30 }
 0x28f   : > { %v173_v31 = vsel %vm172_vm4, 2147483648, %v651_v3 }
 0x290   : > { %v174_v32 = vsel %vm139_vm0, %v173_v31, 2147483648 }
 0x291   : > { %v176_v33 = vshra.s32 %v174_v32, 16  ;;  %v175_v35 = vand.u32 65535, %v174_v32 }
 0x293   : > { %v178_v34 = vcvt.s32.f32 %v176_v33  ;;  %v177_v37 = vcvt.s32.f32 %v175_v35 }
 0x295   : > { %179 = vmax.xlane.f32.xlu0 %v178_v34 }
 0x322   : > { %v180_v36 = vpop.xlane.xlu0 %179 }
 0x323   : > { %vm181_vm5 = vcmp.eq.f32.partialorder %v178_v34, %v180_v36  ;;  %v186_v39 = vcvt.f32.s32 %v180_v36 }
 0x324   : > { %v182_v38 = vsel %vm181_vm5, %v177_v37, -inf }
 0x325   : > { %183 = vmax.xlane.f32.xlu1 %v182_v38  ;;  %v187_v41 = vshll.u32 %v186_v39, 16 }
 0x3b2   : > { %v184_v40 = vpop.xlane.xlu1 %183 }
 0x3b3   : > { %v185_v42 = vcvt.f32.s32 %v184_v40 }
 0x3b5   : > { %v188_v43 = vadd.s32 %v187_v41, %v185_v42 }
 0x3b7   : > { %vm189_vm6 = vcmp.eq.s32.totalorder %v173_v31, %v188_v43 }
 0x3b8   : > { %v190_v44 = vsel %vm189_vm6, %v655_v16, 32 }
 0x3b9   : > { %v191_v45 = vsel %vm139_vm0, %v190_v44, 2147483647 }
 0x3ba   : > { %v193_v46 = vshra.s32 %v191_v45, 16  ;;  %v192_v48 = vand.u32 65535, %v191_v45 }
 0x3bc   : > { %v195_v47 = vcvt.s32.f32 %v193_v46  ;;  %v194_v50 = vcvt.s32.f32 %v192_v48 }
 0x3be   : > { %196 = vmin.xlane.f32.xlu0 %v195_v47 }
 0x44b   : > { %v197_v49 = vpop.xlane.xlu0 %196 }
 0x44c   : > { %vm198_vm7 = vcmp.eq.f32.partialorder %v195_v47, %v197_v49  ;;  %v203_v52 = vcvt.f32.s32 %v197_v49 }
 0x44d   : > { %v199_v51 = vsel %vm198_vm7, %v194_v50, inf }
 0x44e   : > { %200 = vmin.xlane.f32.xlu1 %v199_v51  ;;  %v204_v54 = vshll.u32 %v203_v52, 16 }
 0x4db   : > { %v201_v53 = vpop.xlane.xlu1 %200 }
 0x4dc   : > { %v202_v55 = vcvt.f32.s32 %v201_v53 }
 0x4de   : > { %v205_v56 = vadd.s32 %v204_v54, %v202_v55 }
 0x4e0   : > { %vm206_vm8 = vcmp.eq.s32.totalorder %v655_v16, %v205_v56 }
 0x4e1   : > { %vm670_vm9 = vmor %vm172_vm4, %vm206_vm8 }
 0x4e2   : > { %v208_v58 = vsel %vm670_vm9, 2147483648, %v651_v3 }
 0x4e3   : > { %v209_v59 = vsel %vm139_vm0, %v208_v58, 2147483648 }
 0x4e4   : > { %v211_v60 = vshra.s32 %v209_v59, 16  ;;  %v210_v62 = vand.u32 65535, %v209_v59 }
 0x4e6   : > { %v213_v61 = vcvt.s32.f32 %v211_v60  ;;  %v212_v1 = vcvt.s32.f32 %v210_v62 }
 0x4e8   : > { %214 = vmax.xlane.f32.xlu0 %v213_v61 }
 0x575   : > { %v215_v63 = vpop.xlane.xlu0 %214 }
 0x576   : > { %vm216_vm10 = vcmp.eq.f32.partialorder %v213_v61, %v215_v63  ;;  %v221_v4 = vcvt.f32.s32 %v215_v63 }
 0x577   : > { %v217_v2 = vsel %vm216_vm10, %v212_v1, -inf }
 0x578   : > { %218 = vmax.xlane.f32.xlu1 %v217_v2  ;;  %v222_v6 = vshll.u32 %v221_v4, 16 }
 0x605   : > { %v219_v5 = vpop.xlane.xlu1 %218 }
 0x606   : > { %v220_v7 = vcvt.f32.s32 %v219_v5 }
 0x608   : > { %v223_v8 = vadd.s32 %v222_v6, %v220_v7 }
 0x60a   : > { %vm224_vm11 = vcmp.eq.s32.totalorder %v208_v58, %v223_v8 }
 0x60b   : > { %v225_v9 = vsel %vm224_vm11, %v655_v16, 32 }
 0x60c   : > { %v226_v10 = vsel %vm139_vm0, %v225_v9, 2147483647 }
 0x60d   : > { %v228_v11 = vshra.s32 %v226_v10, 16  ;;  %v227_v13 = vand.u32 65535, %v226_v10 }
 0x60f   : > { %v230_v12 = vcvt.s32.f32 %v228_v11  ;;  %v229_v15 = vcvt.s32.f32 %v227_v13 }
 0x611   : > { %231 = vmin.xlane.f32.xlu0 %v230_v12 }
 0x69e   : > { %v232_v14 = vpop.xlane.xlu0 %231 }
 0x69f   : > { %vm233_vm12 = vcmp.eq.f32.partialorder %v230_v12, %v232_v14  ;;  %v238_v18 = vcvt.f32.s32 %v232_v14 }
 0x6a0   : > { %v234_v17 = vsel %vm233_vm12, %v229_v15, inf }
 0x6a1   : > { %235 = vmin.xlane.f32.xlu1 %v234_v17  ;;  %v239_v20 = vshll.u32 %v238_v18, 16 }
 0x72e   : > { %v236_v19 = vpop.xlane.xlu1 %235 }
 0x72f   : > { %v237_v21 = vcvt.f32.s32 %v236_v19 }
 0x731   : > { %v240_v22 = vadd.s32 %v239_v20, %v237_v21 }
 0x733   : > { %vm241_vm13 = vcmp.eq.s32.totalorder %v655_v16, %v240_v22 }
 0x734   : > { %vm683_vm14 = vmor %vm670_vm9, %vm241_vm13 }
 0x735   : > { %v243_v24 = vsel %vm683_vm14, 2147483648, %v651_v3 }
 0x736   : > { %v244_v25 = vsel %vm139_vm0, %v243_v24, 2147483648 }
 0x737   : > { %v246_v26 = vshra.s32 %v244_v25, 16  ;;  %v245_v28 = vand.u32 65535, %v244_v25 }
 0x739   : > { %v248_v27 = vcvt.s32.f32 %v246_v26  ;;  %v247_v30 = vcvt.s32.f32 %v245_v28 }
 0x73b   : > { %249 = vmax.xlane.f32.xlu0 %v248_v27 }
 0x7c8   : > { %v250_v29 = vpop.xlane.xlu0 %249 }
 0x7c9   : > { %vm251_vm15 = vcmp.eq.f32.partialorder %v248_v27, %v250_v29  ;;  %v256_v32 = vcvt.f32.s32 %v250_v29 }
 0x7ca   : > { %v252_v31 = vsel %vm251_vm15, %v247_v30, -inf }
 0x7cb   : > { %253 = vmax.xlane.f32.xlu1 %v252_v31  ;;  %v257_v34 = vshll.u32 %v256_v32, 16 }
 0x858   : > { %v254_v33 = vpop.xlane.xlu1 %253 }
 0x859   : > { %v255_v35 = vcvt.f32.s32 %v254_v33 }
 0x85b   : > { %v258_v36 = vadd.s32 %v257_v34, %v255_v35 }
 0x85d   : > { %vm259_vm1 = vcmp.eq.s32.totalorder %v243_v24, %v258_v36 }
 0x85e   : > { %v260_v37 = vsel %vm259_vm1, %v655_v16, 32 }
 0x85f   : > { %v261_v3 = vsel %vm139_vm0, %v260_v37, 2147483647 }
 0x860   : > { %v263_v38 = vshra.s32 %v261_v3, 16  ;;  %v262_v40 = vand.u32 65535, %v261_v3 }
 0x862   : > { %v265_v39 = vcvt.s32.f32 %v263_v38  ;;  %v264_v42 = vcvt.s32.f32 %v262_v40 }
 0x864   : > { %266 = vmin.xlane.f32.xlu0 %v265_v39 }
 0x8f1   : > { %v267_v41 = vpop.xlane.xlu0 %266 }
 0x8f2   : > { %vm268_vm2 = vcmp.eq.f32.partialorder %v265_v39, %v267_v41  ;;  %v273_v44 = vcvt.f32.s32 %v267_v41 }
 0x8f3   : > { %v269_v43 = vsel %vm268_vm2, %v264_v42, inf }
 0x8f4   : > { %270 = vmin.xlane.f32.xlu1 %v269_v43  ;;  %v274_v46 = vshll.u32 %v273_v44, 16 }
 0x981   : > { %v271_v45 = vpop.xlane.xlu1 %270 }
 0x982   : > { %v272_v47 = vcvt.f32.s32 %v271_v45 }
 0x984   : > { %v275_v48 = vadd.s32 %v274_v46, %v272_v47 }
 0x986   : > { %vm276_vm3 = vcmp.eq.s32.totalorder %v655_v16, %v275_v48 }
 0x987   : > { %vm277_vm4 = vmor %vm683_vm14, %vm276_vm3 }
 0x988   : > { %v278_v49 = vsel %vm277_vm4, %v647_v0, 0.0 }
 0x989   : > { %279 = vst.msk [vmem:[%s131_s25] sm:$0xff] %vm139_vm0, %v278_v49 }
 0x98a   : > { %465 = shalt.err (!%p462_p4)
}
 0x98b   : > { %s466_s5 = scalar_lea.hbm %s702_s29, 128  ;;  %s470_s14 = scalar_lea.hbm %s749_s1, 256 }
 0x98c   : > { %p467_p5 = scmp.ne.s32.totalorder %s702_s29, %s466_s5  ;;  %p471_p0 = scmp.lt.u32.totalorder %s702_s29, %s749_s1 }
 0x98d   : > { %p472_p1 = scmp.lt.u32.totalorder %s470_s14, %s466_s5  ;;  %p474_p6 = scmp.lt.u32.totalorder %s466_s5, %s702_s29 }
 0x98e   : > { %p468_p8 = pnand %p467_p5, %p762_p11 }
 0x98f   : > { %p473_p3 = por %p472_p1, %p471_p0 }
 0x990   : > { %p469_p9 = pneg %p468_p8 }
 0x991   : > { %p475_p12 = por %p474_p6, %p473_p3 }
 0x993   : > { %p476_p13 = pnand %p475_p12, %p469_p9 }
 0x995   : > { %479 = shalt.err (!%p476_p13)
}
 0x996   : > { %378 = dma.vmem_to_hbm [thread:$0]  (%p762_p11), %s704_s26, 128, %s702_s29, %s281_s10  }
 0x997 PF: > { %s306_s21 = sand.u32 1, %s506_s6   ;;  %p763_p7 = scmp.ne.s32.totalorder %s754_s19, 0 }
 0x998   : > { %p764_p10 = scmp.ge.s32.totalorder %s518_s9, 2  ;;  %s307_s22 = scalar_lea.sflag [#allocation4], %s306_s21 }
 0x99a   : > { %p385_p2 = pnand %p764_p10, %p763_p7 }
 0x99c   : > { %501 = dma.done.wait (!%p385_p2), %s307_s22, 128  }
 0x99d   : > { %503 = vsyncadd (!%p385_p2), %s307_s22, 4294967168  ;;  %p14_p4 = scmp.ge.s32.totalorder %s557_s12, 4   ;;  %s765_s6 = smov %s510_s7 }
 0x99e   : > { %s766_s7 = smov %s514_s8  ;;  %s767_s8 = smov %s569_s15 }
 0x99f   : > { %s768_s9 = smov %s557_s12  ;;  %16 = sbr.rel (!%p14_p4) target bundleno = 5 (0x5), region = 69 }
 0x9a6   :  { %312 = vsyncpa [#allocation3], 1 }
 0x9a7   :  { %314 = vsyncpa [#allocation3 + $0x1], 1 }
 0x9a8   :  { %315 = vsyncpa [#allocation4], 1 }
 0x9a9   :  { %317 = vsyncpa [#allocation4 + $0x1], 1 }

</bundles_post_ra>
